<compile_context>
chip_gen: v7x
topology: tpu7x:2x2x1
jax: 0.10.0
libtpu: 0.0.40
codegen_flags: <defaults>
</compile_context>

<pallas_src>
import functools

import jax
import jax.numpy as jnp
from jax.experimental import pallas as pl
from jax.experimental.pallas import tpu as pltpu


def _pick_b_blk(n, lanes_per_elem):
    """Pick how many batch elements to pack into the lane dim per grid step.

    Packs up to ~512 lanes worth of columns (amortizes per-step overhead, fills lanes
    for short sequences) but keeps >= 2 parallel grid steps for megacore once a single
    batch element is already lane-dense."""
    best = 1
    for b in range(1, n + 1):
        if n % b != 0:
            continue
        if b * lanes_per_elem > 512:
            continue
        if (n // b) < 2 and n > 1 and lanes_per_elem >= 256:
            continue
        best = b
    return best


def _conv_block_kernel(x_ref, w1_ref, b1_ref, w2_ref, b2_ref, o_ref,
                       stack1_ref, stack2_ref, *,
                       k, cyclic, pad_l, b_blk, c_in, c_out, l_in, l_mid, l_out):
    # x_ref : (b_blk, C_in, L_in)            w1_ref: (C_out, k*C_in)   b1_ref: (C_out, 1)
    # o_ref : (b_blk, C_out, L_out)          w2_ref: (C_out, k*C_out)  b2_ref: (C_out, 1)
    # stack1_ref: (k*C_in,  b_blk*L_mid)  VMEM im2col scratch for conv1
    # stack2_ref: (k*C_out, b_blk*L_out)  VMEM im2col scratch for conv2
    cdt = stack1_ref.dtype

    # ---- im2col stack for conv1 (padding fused; data lands straight from x block) ----
    for j in range(k):
        r0, r1 = j * c_in, (j + 1) * c_in
        for b in range(b_blk):
            base = b * l_mid
            if cyclic:
                wrap = k - 1 - j                      # left circular halo width
                if wrap > 0:
                    stack1_ref[r0:r1, base:base + wrap] = x_ref[b, :, l_in - wrap:]
                stack1_ref[r0:r1, base + wrap:base + l_mid] = x_ref[b, :, :l_mid - wrap]
            else:
                lo = max(0, pad_l - j)
                hi = min(l_mid, pad_l - j + l_in)
                if lo > 0:        # tiny zero halos only (not the whole buffer)
                    stack1_ref[r0:r1, base:base + lo] = jnp.zeros((c_in, lo), cdt)
                if hi < l_mid:
                    stack1_ref[r0:r1, base + hi:base + l_mid] = (
                        jnp.zeros((c_in, l_mid - hi), cdt))
                stack1_ref[r0:r1, base + lo:base + hi] = (
                    x_ref[b, :, lo + j - pad_l:hi + j - pad_l])

    # ---- conv1: ONE MXU contraction over k*C_in, f32 accumulate, bias + ReLU ----
    acc1 = jnp.dot(w1_ref[...], stack1_ref[...], preferred_element_type=jnp.float32)
    h = jnp.maximum(acc1 + b1_ref[...], 0.0).astype(cdt)   # (C_out, b_blk*L_mid)
    # TODO(synk): Dropout is inference-mode identity here.

    # ---- im2col stack for conv2, built directly from h (never touches HBM) ----
    for j in range(k):
        r0, r1 = j * c_out, (j + 1) * c_out
        for b in range(b_blk):
            hbase = b * l_mid
            obase = b * l_out
            if cyclic:
                wrap = k - 1 - j
                if wrap > 0:
                    stack2_ref[r0:r1, obase:obase + wrap] = (
                        h[:, hbase + l_mid - wrap:hbase + l_mid])
                stack2_ref[r0:r1, obase + wrap:obase + l_out] = (
                    h[:, hbase:hbase + l_out - wrap])
            else:
                lo = max(0, pad_l - j)
                hi = min(l_out, pad_l - j + l_mid)
                if lo > 0:
                    stack2_ref[r0:r1, obase:obase + lo] = jnp.zeros((c_out, lo), cdt)
                if hi < l_out:
                    stack2_ref[r0:r1, obase + hi:obase + l_out] = (
                        jnp.zeros((c_out, l_out - hi), cdt))
                stack2_ref[r0:r1, obase + lo:obase + hi] = (
                    h[:, hbase + lo + j - pad_l:hbase + hi + j - pad_l])

    # ---- conv2: ONE MXU contraction, bias + ReLU, store true-width output tile ----
    acc2 = jnp.dot(w2_ref[...], stack2_ref[...], preferred_element_type=jnp.float32)
    out = jnp.maximum(acc2 + b2_ref[...], 0.0)              # (C_out, b_blk*L_out) f32
    for b in range(b_blk):
        o_ref[b] = out[:, b * l_out:(b + 1) * l_out].astype(o_ref.dtype)


def conv_block_forward(x, v1, g1, b1, v2, g2, b2, *, k, padding="zero", dropout=0.0):
    """JAX/Pallas equivalent of ConvBlock.forward (inference mode).

    x:  (N, C_in, L)
    v1: (C_out, C_in, k),  g1: (C_out,), b1: (C_out,)   first weight-normed Conv1d
    v2: (C_out, C_out, k), g2: (C_out,), b2: (C_out,)   second weight-normed Conv1d
    Data-path dtype follows x.dtype (pass bf16 on v6e/v7x); accumulation is f32.
    """
    del dropout  # TODO(synk): inference-mode identity (module default dropout=0)
    n, c_in, l_in = x.shape
    c_out = v1.shape[0]
    assert v1.shape == (c_out, c_in, k) and v2.shape == (c_out, c_out, k)
    cdt = x.dtype

    # fold weight_norm (dim=0) in f32: w = g * v / ||v||_{(in,k)}   -- param-only, once
    def _wn(v, g):
        v32 = v.astype(jnp.float32)
        nrm = jnp.sqrt(jnp.sum(v32 * v32, axis=(1, 2), keepdims=True))
        return (g.astype(jnp.float32).reshape(-1, 1, 1) / nrm) * v32

    # Tap-folded weight matrices (C_out, k*C): tap-j slab lives at columns [j*C,(j+1)*C)
    w1f = jnp.transpose(_wn(v1, g1), (0, 2, 1)).reshape(c_out, k * c_in).astype(cdt)
    w2f = jnp.transpose(_wn(v2, g2), (0, 2, 1)).reshape(c_out, k * c_out).astype(cdt)
    b1c = b1.reshape(c_out, 1).astype(jnp.float32)
    b2c = b2.reshape(c_out, 1).astype(jnp.float32)

    cyclic = padding == "cyclic"
    pad_l = (k - 1) if cyclic else (k // 2)
    pad_r = 0 if cyclic else (k // 2)
    l_mid = l_in + pad_l + pad_r - k + 1
    l_out = l_mid + pad_l + pad_r - k + 1

    b_blk = _pick_b_blk(n, max(l_in, l_out))
    grid = (n // b_blk,)

    kernel = functools.partial(
        _conv_block_kernel, k=k, cyclic=cyclic, pad_l=pad_l, b_blk=b_blk,
        c_in=c_in, c_out=c_out, l_in=l_in, l_mid=l_mid, l_out=l_out)

    # Explicit scoped-VMEM budget: double-buffered x/out blocks + resident weights +
    # im2col scratch, with headroom; clamped to stay within v7x's 64 MiB physical VMEM.
    isz = x.dtype.itemsize
    est = (2 * b_blk * c_in * l_in * isz
           + 2 * b_blk * c_out * l_out * isz
           + 2 * k * c_out * (c_in + c_out) * isz + 4 * c_out * 4
           + (k * c_in * b_blk * l_mid + k * c_out * b_blk * l_out) * isz)
    vmem_limit = int(min(max(2 * est + (8 << 20), 32 << 20), 64 << 20))

    return pl.pallas_call(
        kernel,
        out_shape=jax.ShapeDtypeStruct((n, c_out, l_out), cdt),
        grid_spec=pltpu.PrefetchScalarGridSpec(
            num_scalar_prefetch=0,
            grid=grid,
            in_specs=[
                pl.BlockSpec((b_blk, c_in, l_in), lambda i: (i, 0, 0)),
                pl.BlockSpec((c_out, k * c_in), lambda i: (0, 0)),    # grid-invariant
                pl.BlockSpec((c_out, 1), lambda i: (0, 0)),
                pl.BlockSpec((c_out, k * c_out), lambda i: (0, 0)),   # grid-invariant
                pl.BlockSpec((c_out, 1), lambda i: (0, 0)),
            ],
            out_specs=pl.BlockSpec((b_blk, c_out, l_out), lambda i: (i, 0, 0)),
            scratch_shapes=[
                pltpu.VMEM((k * c_in, b_blk * l_mid), cdt),    # conv1 im2col stack
                pltpu.VMEM((k * c_out, b_blk * l_out), cdt),   # conv2 im2col stack
            ],
        ),
        compiler_params=pltpu.CompilerParams(
            dimension_semantics=("parallel",),
            vmem_limit_bytes=vmem_limit,
        ),
    )(x, w1f, b1c, w2f, b2c)


# ----------------------------- pure-JAX reference -----------------------------
def _ref_conv1d(x, w, b, pad_l, pad_r, cyclic):
    k = w.shape[-1]
    if cyclic:
        xp = jnp.concatenate([x[:, :, x.shape[-1] - pad_l:], x], axis=-1)
    else:
        xp = jnp.pad(x, ((0, 0), (0, 0), (pad_l, pad_r)))
    l_out = xp.shape[-1] - k + 1
    out = jnp.zeros((x.shape[0], w.shape[0], l_out), jnp.float32) + b.reshape(1, -1, 1)
    for j in range(k):
        out = out + jnp.einsum("oi,nil->nol", w[:, :, j], xp[:, :, j:j + l_out])
    return out


def _ref_conv_block(x, v1, g1, b1, v2, g2, b2, *, k, padding):
    def wn(v, g):
        nrm = jnp.sqrt(jnp.sum(v ** 2, axis=(1, 2), keepdims=True))
        return g.reshape(-1, 1, 1) * v / nrm

    cyclic = padding == "cyclic"
    pd_l, pd_r = ((k - 1, 0) if cyclic else (k // 2, k // 2))
    h = jax.nn.relu(_ref_conv1d(x, wn(v1, g1), b1, pd_l, pd_r, cyclic))
    return jax.nn.relu(_ref_conv1d(h, wn(v2, g2), b2, pd_l, pd_r, cyclic))


if __name__ == "__main__":
    key = jax.random.PRNGKey(0)
    batch, in_ch, out_ch, k, seq = 2, 4, 8, 3, 16
    ks = jax.random.split(key, 7)
    x = jax.random.normal(ks[0], (batch, in_ch, seq), dtype=jnp.float32)
    v1 = jax.random.normal(ks[1], (out_ch, in_ch, k), dtype=jnp.float32)
    g1 = jax.random.uniform(ks[2], (out_ch,), jnp.float32, minval=0.5, maxval=1.5)
    b1 = 0.1 * jax.random.normal(ks[3], (out_ch,), dtype=jnp.float32)
    v2 = jax.random.normal(ks[4], (out_ch, out_ch, k), dtype=jnp.float32)
    g2 = jax.random.uniform(ks[5], (out_ch,), jnp.float32, minval=0.5, maxval=1.5)
    b2 = 0.1 * jax.random.normal(ks[6], (out_ch,), dtype=jnp.float32)

    # case 1: f32 path, padding='zero' (default ConvBlock config)
    out_z = conv_block_forward(x, v1, g1, b1, v2, g2, b2, k=k, padding="zero")
    jax.block_until_ready(out_z)
    ref_z = _ref_conv_block(x, v1, g1, b1, v2, g2, b2, k=k, padding="zero")
    assert out_z.shape == ref_z.shape == (batch, out_ch, seq)
    assert jnp.allclose(out_z, ref_z, atol=1e-4, rtol=1e-4)

    # case 2: f32 path, padding='cyclic' (wrap(k-1) before each conv)
    out_c = conv_block_forward(x, v1, g1, b1, v2, g2, b2, k=k, padding="cyclic")
    jax.block_until_ready(out_c)
    ref_c = _ref_conv_block(x, v1, g1, b1, v2, g2, b2, k=k, padding="cyclic")
    assert out_c.shape == ref_c.shape == (batch, out_ch, seq)
    assert jnp.allclose(out_c, ref_c, atol=1e-4, rtol=1e-4)

    # case 3: bf16 data path (v6e/v7x recommendation) — loose tolerance vs f32 reference
    out_bf = conv_block_forward(x.astype(jnp.bfloat16), v1, g1, b1, v2, g2, b2,
                                k=k, padding="zero")
    jax.block_until_ready(out_bf)
    assert out_bf.dtype == jnp.bfloat16
    assert out_bf.shape == ref_z.shape
    assert jnp.allclose(out_bf.astype(jnp.float32), ref_z, atol=0.15, rtol=0.15)

    print("KERNEL_OK")
</pallas_src>

<mosaic_0001>
module attributes {stable_mosaic.version = 11 : i64} {
  func.func @_conv_block_kernel(%arg0: i32, %arg1: memref<2x4x16xf32, #tpu.memory_space<vmem>>, %arg2: memref<8x12xf32, #tpu.memory_space<vmem>>, %arg3: memref<8x1xf32, #tpu.memory_space<vmem>>, %arg4: memref<8x24xf32, #tpu.memory_space<vmem>>, %arg5: memref<8x1xf32, #tpu.memory_space<vmem>>, %arg6: memref<2x8x16xf32, #tpu.memory_space<vmem>>, %arg7: memref<12x32xf32, #tpu.memory_space<vmem>>, %arg8: memref<24x32xf32, #tpu.memory_space<vmem>>) attributes {dimension_semantics = [#tpu.dimension_semantics<parallel>], iteration_bounds = array<i64: 1>, scalar_prefetch = 0 : i64, scratch_operands = 2 : i64, tpu.core_type = #tpu.core_type<tc>, window_params = [{transform_indices = @transform_0, window_bounds = array<i64: 2, 4, 16>}, {pipeline_mode = #tpu.pipeline_mode<synchronous>, transform_indices = @transform_1, window_bounds = array<i64: 8, 12>}, {pipeline_mode = #tpu.pipeline_mode<synchronous>, transform_indices = @transform_2, window_bounds = array<i64: 8, 1>}, {pipeline_mode = #tpu.pipeline_mode<synchronous>, transform_indices = @transform_3, window_bounds = array<i64: 8, 24>}, {pipeline_mode = #tpu.pipeline_mode<synchronous>, transform_indices = @transform_4, window_bounds = array<i64: 8, 1>}, {transform_indices = @transform_5, window_bounds = array<i64: 2, 8, 16>}]} {
    %cst = arith.constant 0.000000e+00 : f32
    %0 = vector.broadcast %cst : f32 to vector<4x1xf32>
    %c0 = arith.constant 0 : index
    %c0_0 = arith.constant 0 : index
    %1 = vector.load %arg7[%c0, %c0_0] : memref<12x32xf32, #tpu.memory_space<vmem>>, vector<4x1xf32>
    tpu.vector_store %arg7[%c0, %c0_0], %0 {strides = array<i32>} : memref<12x32xf32, #tpu.memory_space<vmem>>, vector<4x1xf32>,
    %c0_1 = arith.constant 0 : index
    %c0_2 = arith.constant 0 : index
    %c0_3 = arith.constant 0 : index
    %2 = vector.load %arg1[%c0_1, %c0_2, %c0_3] : memref<2x4x16xf32, #tpu.memory_space<vmem>>, vector<1x4x15xf32>
    %3 = vector.shape_cast %2 : vector<1x4x15xf32> to vector<4x15xf32>
    %c0_4 = arith.constant 0 : index
    %c1 = arith.constant 1 : index
    %4 = vector.load %arg7[%c0_4, %c1] : memref<12x32xf32, #tpu.memory_space<vmem>>, vector<4x15xf32>
    tpu.vector_store %arg7[%c0_4, %c1], %3 {strides = array<i32>} : memref<12x32xf32, #tpu.memory_space<vmem>>, vector<4x15xf32>,
    %cst_5 = arith.constant 0.000000e+00 : f32
    %5 = vector.broadcast %cst_5 : f32 to vector<4x1xf32>
    %c0_6 = arith.constant 0 : index
    %c16 = arith.constant 16 : index
    %6 = vector.load %arg7[%c0_6, %c16] : memref<12x32xf32, #tpu.memory_space<vmem>>, vector<4x1xf32>
    tpu.vector_store %arg7[%c0_6, %c16], %5 {strides = array<i32>} : memref<12x32xf32, #tpu.memory_space<vmem>>, vector<4x1xf32>,
    %c1_7 = arith.constant 1 : index
    %c0_8 = arith.constant 0 : index
    %c0_9 = arith.constant 0 : index
    %7 = vector.load %arg1[%c1_7, %c0_8, %c0_9] : memref<2x4x16xf32, #tpu.memory_space<vmem>>, vector<1x4x15xf32>
    %8 = vector.shape_cast %7 : vector<1x4x15xf32> to vector<4x15xf32>
    %c0_10 = arith.constant 0 : index
    %c17 = arith.constant 17 : index
    %9 = vector.load %arg7[%c0_10, %c17] : memref<12x32xf32, #tpu.memory_space<vmem>>, vector<4x15xf32>
    tpu.vector_store %arg7[%c0_10, %c17], %8 {strides = array<i32>} : memref<12x32xf32, #tpu.memory_space<vmem>>, vector<4x15xf32>,
    %c0_11 = arith.constant 0 : index
    %c0_12 = arith.constant 0 : index
    %c0_13 = arith.constant 0 : index
    %10 = vector.load %arg1[%c0_11, %c0_12, %c0_13] : memref<2x4x16xf32, #tpu.memory_space<vmem>>, vector<1x4x16xf32>
    %11 = vector.shape_cast %10 : vector<1x4x16xf32> to vector<4x16xf32>
    %c4 = arith.constant 4 : index
    %c0_14 = arith.constant 0 : index
    %12 = vector.load %arg7[%c4, %c0_14] : memref<12x32xf32, #tpu.memory_space<vmem>>, vector<4x16xf32>
    tpu.vector_store %arg7[%c4, %c0_14], %11 {strides = array<i32>} : memref<12x32xf32, #tpu.memory_space<vmem>>, vector<4x16xf32>,
    %c1_15 = arith.constant 1 : index
    %c0_16 = arith.constant 0 : index
    %c0_17 = arith.constant 0 : index
    %13 = vector.load %arg1[%c1_15, %c0_16, %c0_17] : memref<2x4x16xf32, #tpu.memory_space<vmem>>, vector<1x4x16xf32>
    %14 = vector.shape_cast %13 : vector<1x4x16xf32> to vector<4x16xf32>
    %c4_18 = arith.constant 4 : index
    %c16_19 = arith.constant 16 : index
    %15 = vector.load %arg7[%c4_18, %c16_19] : memref<12x32xf32, #tpu.memory_space<vmem>>, vector<4x16xf32>
    tpu.vector_store %arg7[%c4_18, %c16_19], %14 {strides = array<i32>} : memref<12x32xf32, #tpu.memory_space<vmem>>, vector<4x16xf32>,
    %cst_20 = arith.constant 0.000000e+00 : f32
    %16 = vector.broadcast %cst_20 : f32 to vector<4x1xf32>
    %c8 = arith.constant 8 : index
    %c15 = arith.constant 15 : index
    %17 = vector.load %arg7[%c8, %c15] : memref<12x32xf32, #tpu.memory_space<vmem>>, vector<4x1xf32>
    tpu.vector_store %arg7[%c8, %c15], %16 {strides = array<i32>} : memref<12x32xf32, #tpu.memory_space<vmem>>, vector<4x1xf32>,
    %c0_21 = arith.constant 0 : index
    %c0_22 = arith.constant 0 : index
    %c1_23 = arith.constant 1 : index
    %18 = vector.load %arg1[%c0_21, %c0_22, %c1_23] : memref<2x4x16xf32, #tpu.memory_space<vmem>>, vector<1x4x15xf32>
    %19 = vector.shape_cast %18 : vector<1x4x15xf32> to vector<4x15xf32>
    %c8_24 = arith.constant 8 : index
    %c0_25 = arith.constant 0 : index
    %20 = vector.load %arg7[%c8_24, %c0_25] : memref<12x32xf32, #tpu.memory_space<vmem>>, vector<4x15xf32>
    tpu.vector_store %arg7[%c8_24, %c0_25], %19 {strides = array<i32>} : memref<12x32xf32, #tpu.memory_space<vmem>>, vector<4x15xf32>,
    %cst_26 = arith.constant 0.000000e+00 : f32
    %21 = vector.broadcast %cst_26 : f32 to vector<4x1xf32>
    %c8_27 = arith.constant 8 : index
    %c31 = arith.constant 31 : index
    %22 = vector.load %arg7[%c8_27, %c31] : memref<12x32xf32, #tpu.memory_space<vmem>>, vector<4x1xf32>
    tpu.vector_store %arg7[%c8_27, %c31], %21 {strides = array<i32>} : memref<12x32xf32, #tpu.memory_space<vmem>>, vector<4x1xf32>,
    %c1_28 = arith.constant 1 : index
    %c0_29 = arith.constant 0 : index
    %c1_30 = arith.constant 1 : index
    %23 = vector.load %arg1[%c1_28, %c0_29, %c1_30] : memref<2x4x16xf32, #tpu.memory_space<vmem>>, vector<1x4x15xf32>
    %24 = vector.shape_cast %23 : vector<1x4x15xf32> to vector<4x15xf32>
    %c8_31 = arith.constant 8 : index
    %c16_32 = arith.constant 16 : index
    %25 = vector.load %arg7[%c8_31, %c16_32] : memref<12x32xf32, #tpu.memory_space<vmem>>, vector<4x15xf32>
    tpu.vector_store %arg7[%c8_31, %c16_32], %24 {strides = array<i32>} : memref<12x32xf32, #tpu.memory_space<vmem>>, vector<4x15xf32>,
    %c0_33 = arith.constant 0 : index
    %c0_34 = arith.constant 0 : index
    %26 = vector.load %arg2[%c0_33, %c0_34] : memref<8x12xf32, #tpu.memory_space<vmem>>, vector<8x12xf32>
    %c0_35 = arith.constant 0 : index
    %c0_36 = arith.constant 0 : index
    %27 = vector.load %arg7[%c0_35, %c0_36] : memref<12x32xf32, #tpu.memory_space<vmem>>, vector<12x32xf32>
    %cst_37 = arith.constant dense<0.000000e+00> : vector<8x32xf32>
    %28 = tpu.matmul %26, %27, %cst_37 {dimension_numbers = #tpu.dot_dimension_numbers<[1], [0], [0], [1], [0, 0, 1, 1], [], []>} : vector<8x12xf32>, vector<12x32xf32>, vector<8x32xf32> -> vector<8x32xf32>
    %c0_38 = arith.constant 0 : index
    %c0_39 = arith.constant 0 : index
    %29 = vector.load %arg3[%c0_38, %c0_39] : memref<8x1xf32, #tpu.memory_space<vmem>>, vector<8x1xf32>
    %30 = vector.broadcast %29 : vector<8x1xf32> to vector<8x32xf32>
    %31 = arith.addf %28, %30 : vector<8x32xf32>
    %cst_40 = arith.constant 0.000000e+00 : f32
    %32 = vector.broadcast %cst_40 : f32 to vector<8x32xf32>
    %33 = arith.maximumf %31, %32 : vector<8x32xf32>
    %cst_41 = arith.constant 0.000000e+00 : f32
    %34 = vector.broadcast %cst_41 : f32 to vector<8x1xf32>
    %c0_42 = arith.constant 0 : index
    %c0_43 = arith.constant 0 : index
    %35 = vector.load %arg8[%c0_42, %c0_43] : memref<24x32xf32, #tpu.memory_space<vmem>>, vector<8x1xf32>
    tpu.vector_store %arg8[%c0_42, %c0_43], %34 {strides = array<i32>} : memref<24x32xf32, #tpu.memory_space<vmem>>, vector<8x1xf32>,
    %36 = vector.extract_strided_slice %33 {offsets = [0, 0], sizes = [8, 15], strides = [1, 1]} : vector<8x32xf32> to vector<8x15xf32>
    %c0_44 = arith.constant 0 : index
    %c1_45 = arith.constant 1 : index
    %37 = vector.load %arg8[%c0_44, %c1_45] : memref<24x32xf32, #tpu.memory_space<vmem>>, vector<8x15xf32>
    tpu.vector_store %arg8[%c0_44, %c1_45], %36 {strides = array<i32>} : memref<24x32xf32, #tpu.memory_space<vmem>>, vector<8x15xf32>,
    %cst_46 = arith.constant 0.000000e+00 : f32
    %38 = vector.broadcast %cst_46 : f32 to vector<8x1xf32>
    %c0_47 = arith.constant 0 : index
    %c16_48 = arith.constant 16 : index
    %39 = vector.load %arg8[%c0_47, %c16_48] : memref<24x32xf32, #tpu.memory_space<vmem>>, vector<8x1xf32>
    tpu.vector_store %arg8[%c0_47, %c16_48], %38 {strides = array<i32>} : memref<24x32xf32, #tpu.memory_space<vmem>>, vector<8x1xf32>,
    %40 = vector.extract_strided_slice %33 {offsets = [0, 16], sizes = [8, 15], strides = [1, 1]} : vector<8x32xf32> to vector<8x15xf32>
    %c0_49 = arith.constant 0 : index
    %c17_50 = arith.constant 17 : index
    %41 = vector.load %arg8[%c0_49, %c17_50] : memref<24x32xf32, #tpu.memory_space<vmem>>, vector<8x15xf32>
    tpu.vector_store %arg8[%c0_49, %c17_50], %40 {strides = array<i32>} : memref<24x32xf32, #tpu.memory_space<vmem>>, vector<8x15xf32>,
    %42 = vector.extract_strided_slice %33 {offsets = [0, 0], sizes = [8, 16], strides = [1, 1]} : vector<8x32xf32> to vector<8x16xf32>
    %c8_51 = arith.constant 8 : index
    %c0_52 = arith.constant 0 : index
    %43 = vector.load %arg8[%c8_51, %c0_52] : memref<24x32xf32, #tpu.memory_space<vmem>>, vector<8x16xf32>
    tpu.vector_store %arg8[%c8_51, %c0_52], %42 {strides = array<i32>} : memref<24x32xf32, #tpu.memory_space<vmem>>, vector<8x16xf32>,
    %44 = vector.extract_strided_slice %33 {offsets = [0, 16], sizes = [8, 16], strides = [1, 1]} : vector<8x32xf32> to vector<8x16xf32>
    %c8_53 = arith.constant 8 : index
    %c16_54 = arith.constant 16 : index
    %45 = vector.load %arg8[%c8_53, %c16_54] : memref<24x32xf32, #tpu.memory_space<vmem>>, vector<8x16xf32>
    tpu.vector_store %arg8[%c8_53, %c16_54], %44 {strides = array<i32>} : memref<24x32xf32, #tpu.memory_space<vmem>>, vector<8x16xf32>,
    %cst_55 = arith.constant 0.000000e+00 : f32
    %46 = vector.broadcast %cst_55 : f32 to vector<8x1xf32>
    %c16_56 = arith.constant 16 : index
    %c15_57 = arith.constant 15 : index
    %47 = vector.load %arg8[%c16_56, %c15_57] : memref<24x32xf32, #tpu.memory_space<vmem>>, vector<8x1xf32>
    tpu.vector_store %arg8[%c16_56, %c15_57], %46 {strides = array<i32>} : memref<24x32xf32, #tpu.memory_space<vmem>>, vector<8x1xf32>,
    %48 = vector.extract_strided_slice %33 {offsets = [0, 1], sizes = [8, 15], strides = [1, 1]} : vector<8x32xf32> to vector<8x15xf32>
    %c16_58 = arith.constant 16 : index
    %c0_59 = arith.constant 0 : index
    %49 = vector.load %arg8[%c16_58, %c0_59] : memref<24x32xf32, #tpu.memory_space<vmem>>, vector<8x15xf32>
    tpu.vector_store %arg8[%c16_58, %c0_59], %48 {strides = array<i32>} : memref<24x32xf32, #tpu.memory_space<vmem>>, vector<8x15xf32>,
    %cst_60 = arith.constant 0.000000e+00 : f32
    %50 = vector.broadcast %cst_60 : f32 to vector<8x1xf32>
    %c16_61 = arith.constant 16 : index
    %c31_62 = arith.constant 31 : index
    %51 = vector.load %arg8[%c16_61, %c31_62] : memref<24x32xf32, #tpu.memory_space<vmem>>, vector<8x1xf32>
    tpu.vector_store %arg8[%c16_61, %c31_62], %50 {strides = array<i32>} : memref<24x32xf32, #tpu.memory_space<vmem>>, vector<8x1xf32>,
    %52 = vector.extract_strided_slice %33 {offsets = [0, 17], sizes = [8, 15], strides = [1, 1]} : vector<8x32xf32> to vector<8x15xf32>
    %c16_63 = arith.constant 16 : index
    %c16_64 = arith.constant 16 : index
    %53 = vector.load %arg8[%c16_63, %c16_64] : memref<24x32xf32, #tpu.memory_space<vmem>>, vector<8x15xf32>
    tpu.vector_store %arg8[%c16_63, %c16_64], %52 {strides = array<i32>} : memref<24x32xf32, #tpu.memory_space<vmem>>, vector<8x15xf32>,
    %c0_65 = arith.constant 0 : index
    %c0_66 = arith.constant 0 : index
    %54 = vector.load %arg4[%c0_65, %c0_66] : memref<8x24xf32, #tpu.memory_space<vmem>>, vector<8x24xf32>
    %c0_67 = arith.constant 0 : index
    %c0_68 = arith.constant 0 : index
    %55 = vector.load %arg8[%c0_67, %c0_68] : memref<24x32xf32, #tpu.memory_space<vmem>>, vector<24x32xf32>
    %cst_69 = arith.constant dense<0.000000e+00> : vector<8x32xf32>
    %56 = tpu.matmul %54, %55, %cst_69 {dimension_numbers = #tpu.dot_dimension_numbers<[1], [0], [0], [1], [0, 0, 1, 1], [], []>} : vector<8x24xf32>, vector<24x32xf32>, vector<8x32xf32> -> vector<8x32xf32>
    %c0_70 = arith.constant 0 : index
    %c0_71 = arith.constant 0 : index
    %57 = vector.load %arg5[%c0_70, %c0_71] : memref<8x1xf32, #tpu.memory_space<vmem>>, vector<8x1xf32>
    %58 = vector.broadcast %57 : vector<8x1xf32> to vector<8x32xf32>
    %59 = arith.addf %56, %58 : vector<8x32xf32>
    %cst_72 = arith.constant 0.000000e+00 : f32
    %60 = vector.broadcast %cst_72 : f32 to vector<8x32xf32>
    %61 = arith.maximumf %59, %60 : vector<8x32xf32>
    %62 = vector.extract_strided_slice %61 {offsets = [0, 0], sizes = [8, 16], strides = [1, 1]} : vector<8x32xf32> to vector<8x16xf32>
    %c0_73 = arith.constant 0 : index
    %c0_74 = arith.constant 0 : index
    %c0_75 = arith.constant 0 : index
    %63 = vector.load %arg6[%c0_73, %c0_74, %c0_75] : memref<2x8x16xf32, #tpu.memory_space<vmem>>, vector<1x8x16xf32>
    %64 = vector.shape_cast %63 : vector<1x8x16xf32> to vector<8x16xf32>
    %65 = vector.shape_cast %62 : vector<8x16xf32> to vector<1x8x16xf32>
    tpu.vector_store %arg6[%c0_73, %c0_74, %c0_75], %65 {strides = array<i32>} : memref<2x8x16xf32, #tpu.memory_space<vmem>>, vector<1x8x16xf32>,
    %66 = vector.extract_strided_slice %61 {offsets = [0, 16], sizes = [8, 16], strides = [1, 1]} : vector<8x32xf32> to vector<8x16xf32>
    %c1_76 = arith.constant 1 : index
    %c0_77 = arith.constant 0 : index
    %c0_78 = arith.constant 0 : index
    %67 = vector.load %arg6[%c1_76, %c0_77, %c0_78] : memref<2x8x16xf32, #tpu.memory_space<vmem>>, vector<1x8x16xf32>
    %68 = vector.shape_cast %67 : vector<1x8x16xf32> to vector<8x16xf32>
    %69 = vector.shape_cast %66 : vector<8x16xf32> to vector<1x8x16xf32>
    tpu.vector_store %arg6[%c1_76, %c0_77, %c0_78], %69 {strides = array<i32>} : memref<2x8x16xf32, #tpu.memory_space<vmem>>, vector<1x8x16xf32>,
    return
  }
  func.func @transform_0(%arg0: i32) -> (i32, i32, i32) {
    %c0_i32 = arith.constant 0 : i32
    %c0_i32_0 = arith.constant 0 : i32
    %c0_i32_1 = arith.constant 0 : i32
    return %arg0, %c0_i32, %c0_i32_0 : i32, i32, i32
  }
  func.func @transform_1(%arg0: i32) -> (i32, i32) {
    %c0_i32 = arith.constant 0 : i32
    %c0_i32_0 = arith.constant 0 : i32
    %c0_i32_1 = arith.constant 0 : i32
    return %c0_i32, %c0_i32_0 : i32, i32
  }
  func.func @transform_2(%arg0: i32) -> (i32, i32) {
    %c0_i32 = arith.constant 0 : i32
    %c0_i32_0 = arith.constant 0 : i32
    %c0_i32_1 = arith.constant 0 : i32
    return %c0_i32, %c0_i32_0 : i32, i32
  }
  func.func @transform_3(%arg0: i32) -> (i32, i32) {
    %c0_i32 = arith.constant 0 : i32
    %c0_i32_0 = arith.constant 0 : i32
    %c0_i32_1 = arith.constant 0 : i32
    return %c0_i32, %c0_i32_0 : i32, i32
  }
  func.func @transform_4(%arg0: i32) -> (i32, i32) {
    %c0_i32 = arith.constant 0 : i32
    %c0_i32_0 = arith.constant 0 : i32
    %c0_i32_1 = arith.constant 0 : i32
    return %c0_i32, %c0_i32_0 : i32, i32
  }
  func.func @transform_5(%arg0: i32) -> (i32, i32, i32) {
    %c0_i32 = arith.constant 0 : i32
    %c0_i32_0 = arith.constant 0 : i32
    %c0_i32_1 = arith.constant 0 : i32
    return %arg0, %c0_i32, %c0_i32_0 : i32, i32, i32
  }
}

</mosaic_0001>

<bundles_post_ra>
// kernel: tpu_custom_call.1
= control target key start
LH: loop header
LB: loop body
LE: loop exit
PB: predicated region body
PF: predicated region fallthrough
CT: control target
= control target key end

     0   :  { %s367_s22 = smov 17   ;;  %s368_s23 = smov 1   ;;  %vm21_vm0 = vcmask 3072   ;;  %vm41_vm1 = vcmask 125952   ;;  %v369_v5 = vmov 0.0   ;;  %vm50_vm2 = vcmask 126072   ;;  %s471_s0 = inlined_call_operand.vmem [shape: f32[2,4,16], index: 0, kind: input, shape index: {}]   ;;  %s472_s1 = inlined_call_operand.vmem [shape: f32[8,12], index: 1, kind: input, shape index: {}]   ;;  %s473_s2 = inlined_call_operand.vmem [shape: f32[8,1], index: 2, kind: input, shape index: {}]   ;;  %s474_s3 = inlined_call_operand.vmem [shape: f32[8,24], index: 3, kind: input, shape index: {}]   ;;  %s475_s4 = inlined_call_operand.vmem [shape: f32[8,1], index: 4, kind: input, shape index: {}]   ;;  %s476_s5 = inlined_call_operand.hbm [shape: f32[2,8,16], index: 5, kind: output, shape index: {}]  }
   0x1   :  { %v291_v0 = vld [vmem:[%s471_s0 + $0x4] sm:$0xf]  ;;  %v23_v1 = vld [vmem:[%s471_s0] sm:$0xf]  ;;  %22 = vst.msk [vmem:[#allocation2] sm:$0xf] %vm21_vm0, %v369_v5 }
   0x2   :  { %35 = vrot.lane.b32.xlu1 %v291_v0, %s367_s22  ;;  %25 = vrot.lane.b32.xlu0 %v23_v1, %s368_s23  ;;  %v292_v2 = vld [vmem:[%s471_s0 + $0x4] sm:$0xf]  ;;  %v52_v3 = vld [vmem:[%s471_s0] sm:$0xf] }
   0x3   :  { %v40_v4 = vld [vmem:[%s471_s0] sm:$0xf] }
   0x4   :  { %42 = vst.msk [vmem:[#allocation2 + $0x4] sm:$0xf] %vm41_vm1, %v40_v4 }
   0x5   :  { %10 = vsyncpa [#allocation5], 0  ;;  %s370_s30 = smov 16   ;;  %s371_s6 = smov 127   ;;  %51 = vst.msk [vmem:[#allocation2 + $0x8] sm:$0xf] %vm50_vm2, %v369_v5 }
   0x6   :  { %45 = vrot.lane.b32.xlu1 %v292_v2, %s370_s30  ;;  %54 = vrot.lane.b32.xlu0 %v52_v3, %s371_s6  ;;  %v293_v6 = vld [vmem:[%s471_s0 + $0x4] sm:$0xf]  ;;  %v372_v7 = vmov 0.0|0.0   ;;  %vm373_vm3 = vmmov 0   ;;  %s374_s9 = smov 15   ;;  %v375_v9 = vmov 0  }
   0x7   :  { %320 = vmatprep.subr.bf16.mxu0 %v372_v7  ;;  %324 = vmatprep.subr.bf16.mxu1 %v372_v7  ;;  %v71_v8 = vld [vmem:[%s473_s2] sm:$0xff]  ;;  %vm28_vm4 = vcmask 125960   ;;  %vm30_vm5 = vcmask 134272   ;;  %vm38_vm6 = vcmask 257160   ;;  %vm48_vm7 = vcmask 257152   ;;  %s377_s14 = smov 112  }
   0x8   :  { %308 = vmatprep.mubr.msk.f32.mxu0 %vm373_vm3, %v369_v5  ;;  %317 = vmatprep.mubr.msk.f32.mxu1 %vm373_vm3, %v369_v5  ;;  %vm57_vm8 = vcmask 117760   ;;  %vm59_vm9 = vcmask 257272   ;;  %vm66_vm10 = vcmask 248960   ;;  %vm81_vm11 = vcmask 1043456   ;;  %v68_v18 = vld [vmem:[%s472_s1] sm:$0xff]  ;;  %s378_s15 = smov [#allocation4]  }
   0x9   :  { %341 = vset.pattern.permute.xlu1 %v375_v9  ;;  %342 = vset.pattern.permute.xlu0 %v375_v9  ;;  %vm376_vm12 = vmmov 1   ;;  %vm77_vm14 = vcmask 97280   ;;  %vm172_vm15 = vcmask 130168   ;;  %vm156_vm0 = vcmask 7168   ;;  %v187_v24 = vld [vmem:[%s475_s4] sm:$0xff]  ;;  %s280_s16 = sshll.u32 %s378_s15, 4  ;;  %s281_s16 = int_to_ptr.vmem [resolvable:$true] %s280_s16 }
   0xa   :  { %63 = vrot.lane.b32.xlu0 %v293_v6, %s374_s9  ;;  %74 = vperm.xlu1 %341, %v71_v8   ;;  %vm322_vm13 = vmpackc.low %vm81_vm11, %vm376_vm12  ;;  %173 = vst.msk [vmem:[#allocation3 + $0x10] sm:$0xff] %vm172_vm15, %v369_v5  ;;  %vm168_vm1 = vcmask 130048   ;;  %vm170_vm2 = vcmask 261248   ;;  %vm177_vm3 = vcmask 121856   ;;  %v183_v30 = vld [vmem:[%s474_s3] sm:$0xff]  ;;  %s343_s3 = scalar_lea.vmem %s281_s16, 256  ;;  %p348_p1 = scmp.lt.s32.totalorder %s281_s16, %s281_s16 }
   0xb   :  { %157 = vst.msk [vmem:[#allocation3] sm:$0xff] %vm156_vm0, %v369_v5  ;;  %p344_p0 = scmp.ne.s32.totalorder %s281_s16, %s343_s3  ;;  %p349_p2 = scmp.lt.s32.totalorder %s343_s3, %s343_s3 }
   0xd   :  { %p350_p3 = por %p349_p2, %p348_p1 }
   0xf   :  { %p351_p4 = pnand %p350_p3, %p344_p0 }
  0x74   :  { %v36_v10 = vpop.permute.xlu1 %35  ;;  %v26_v11 = vpop.permute.xlu0 %25 }
  0x75   :  { %29 = vst.msk [vmem:[#allocation2] sm:$0xf] %vm28_vm4, %v26_v11  ;;  %vm162_vm4 = vcmask 130056  }
  0x76   :  { %31 = vst.msk [vmem:[#allocation2] sm:$0xf] %vm30_vm5, %v369_v5  ;;  %vm179_vm5 = vcmask 261368  }
  0x77   :  { %39 = vst.msk [vmem:[#allocation2] sm:$0xf] %vm38_vm6, %v36_v10  ;;  %vm164_vm6 = vcmask 138368  }
  0x78   :  { %v46_v12 = vpop.permute.xlu1 %45  ;;  %v55_v13 = vpop.permute.xlu0 %54 }
  0x79   :  { %49 = vst.msk [vmem:[#allocation2 + $0x4] sm:$0xf] %vm48_vm7, %v46_v12  ;;  %vm181_vm7 = vcmask 253056  }
  0x7a   :  { %58 = vst.msk [vmem:[#allocation2 + $0x8] sm:$0xf] %vm57_vm8, %v55_v13  ;;  %vm166_vm8 = vcmask 261256  }
  0x7b   :  { %60 = vst.msk [vmem:[#allocation2 + $0x8] sm:$0xf] %vm59_vm9, %v369_v5  ;;  %vm193_vm9 = vcmask 195584  }
  0x7c   :  { %v64_v14 = vpop.permute.xlu0 %63 }
  0x7d   :  { %67 = vst.msk [vmem:[#allocation2 + $0x8] sm:$0xf] %vm66_vm10, %v64_v14 }
  0x80   :  { %v69_v15 = vld [vmem:[#allocation2] sm:$0xff] }
  0x84   :  { %v70_v16 = vld [vmem:[#allocation2 + $0x8] sm:$0xf] }
  0x85   :  { %v321_v17 = vpack.c.bf16 %v70_v16, %v69_v15 }
  0x87   :  { %323 = vmatpush3.bf16.msk.msra.mxu0 %vm322_vm13, %v321_v17 }
  0x89   :  { %v75_v19 = vpop.permute.xlu1 %74 }
  0x8a   :  { %309 = vmatmul.mubr.msk.f32.vlgmr.msra.gmra.mrb[0].mxu0 %vm77_vm14, %v68_v18 }
 0x15d   :  { %v151_v20 = vpop.f32.mrb[0].mxu0 }
 0x15e   :  { %v152_v21 = vadd.f32 %v151_v20, %v75_v19  ;;  %v310_v22 = vpop.f32.mrb[1].mxu0 }
 0x160   :  { %v155_v23 = vmax.f32 %v152_v21, 0.0 }
 0x162   :  { %169 = vst.msk [vmem:[#allocation3 + $0x8] sm:$0xff] %vm168_vm1, %v155_v23  ;;  %174 = vrot.lane.b32.xlu1 %v155_v23, %s371_s6  ;;  %159 = vrot.lane.b32.xlu0 %v155_v23, %s368_s23 }
 0x163   :  { %171 = vst.msk [vmem:[#allocation3 + $0x8] sm:$0xff] %vm170_vm2, %v155_v23 }
 0x166   :  { %190 = vperm.xlu0 %342, %v187_v24  }
 0x16a   :  { %v185_v28 = vld [vmem:[#allocation3 + $0x8] sm:$0xff] }
 0x1d4   :  { %v175_v25 = vpop.permute.xlu1 %174  ;;  %v160_v26 = vpop.permute.xlu0 %159 }
 0x1d5   :  { %178 = vst.msk [vmem:[#allocation3 + $0x10] sm:$0xff] %vm177_vm3, %v175_v25 }
 0x1d6   :  { %163 = vst.msk [vmem:[#allocation3] sm:$0xff] %vm162_vm4, %v160_v26 }
 0x1d7   :  { %180 = vst.msk [vmem:[#allocation3 + $0x10] sm:$0xff] %vm179_vm5, %v369_v5 }
 0x1d8   :  { %165 = vst.msk [vmem:[#allocation3] sm:$0xff] %vm164_vm6, %v369_v5 }
 0x1d9   :  { %182 = vst.msk [vmem:[#allocation3 + $0x10] sm:$0xff] %vm181_vm7, %v175_v25 }
 0x1da   :  { %167 = vst.msk [vmem:[#allocation3] sm:$0xff] %vm166_vm8, %v160_v26 }
 0x1e0   :  { %v186_v31 = vld [vmem:[#allocation3 + $0x10] sm:$0xff] }
 0x1e1   :  { %v184_v27 = vld [vmem:[#allocation3] sm:$0xff] }
 0x1e2   :  { %v325_v29 = vpack.c.bf16 %v185_v28, %v184_v27 }
 0x1e4   :  { %326 = vmatpush3.bf16.msra.mxu1 %v325_v29 }
 0x1e5   :  { %315 = vmatprep.subr.mxu1 %v369_v5  ;;  %v191_v32 = vpop.permute.xlu0 %190 }
 0x1e8   :  { %316 = vmatpush3.msra.mxu1 %v186_v31 }
 0x1e9   :  { %318 = vmatmul.mubr.msk.f32.vlgmr.msra.gmra.mrb[0].mxu1 %vm193_vm9, %v183_v30 }
 0x2bc   :  { %v263_v33 = vpop.f32.mrb[0].mxu1 }
 0x2bd   :  { %v264_v34 = vadd.f32 %v263_v33, %v191_v32  ;;  %v319_v35 = vpop.f32.mrb[1].mxu1 }
 0x2bf   :  { %v267_v36 = vmax.f32 %v264_v34, 0.0 }
 0x2c1   :  { %268 = vst.msk [vmem:[#allocation4] sm:$0xff] %vm168_vm1, %v267_v36  ;;  %270 = vrot.lane.b32.xlu1 %v267_v36, %s377_s14 }
 0x333   :  { %v271_v37 = vpop.permute.xlu1 %270 }
 0x334   :  { %274 = vst.msk [vmem:[#allocation4 + $0x8] sm:$0xff] %vm168_vm1, %v271_v37 }
 0x335   :  { %354 = shalt.err (!%p351_p4)
}
 0x336   :  { %s355_s19 = scalar_lea.hbm %s476_s5, 256 }
 0x337   :  { %p356_p5 = scmp.ne.s32.totalorder %s476_s5, %s355_s19  ;;  %p359_p6 = scmp.lt.u32.totalorder %s355_s19, %s476_s5 }
 0x339   :  { %p361_p7 = pnand %p359_p6, %p356_p5 }
 0x33b   :  { %364 = shalt.err (!%p361_p7)
}
 0x33c   :  { %s379_s24 = smov 128   ;;  %s380_s25 = smov 8  }
 0x33d   :  { %286 = dma.vmem_to_hbm [thread:$0]  %s281_s16, 256, %s476_s5, [#allocation5], %s379_s24, %s379_s24, %s380_s25  }
 0x33e   :  { %365 = dma.done.wait [#allocation5], 256  }
 0x33f   :  { %366 = vsyncadd [#allocation5], 4294967040 }
 0x340   :  { %290 = vsyncpa [#allocation5], 1 }

</bundles_post_ra>
